<compile_context>
chip_gen: v6e
topology: v6e:2x2x1
jax: 0.10.0
libtpu: 0.0.40
codegen_flags: <defaults>
</compile_context>

<pallas_src>
import functools

import jax
import jax.numpy as jnp
import numpy as np
from jax.experimental import pallas as pl
from jax.experimental.pallas import tpu as pltpu

_LANES = 128


def _maxpool_rows_kernel(*refs, window, stride, pad, xlen, out_cols):
    """Sliding-window max over rows of a (cyclically padded) signal.

    refs (pad > 0):  wrap_ref (TR, pad), x_ref (TR, xlen), o_ref (TR, out_cols),
                     scr_ref (TR, s_width)
    refs (pad == 0): x_ref (TR, xlen), o_ref (TR, out_cols), scr_ref (TR, s_width)
    """
    if pad:
        wrap_ref, x_ref, o_ref, scr_ref = refs
    else:
        x_ref, o_ref, scr_ref = refs

    # Stage [wrap | x] into the VMEM scratch row buffer (fused cyclic padding).
    if pad:
        scr_ref[:, pl.ds(0, pad)] = wrap_ref[...]
    scr_ref[:, pl.ds(pad, xlen)] = x_ref[...]
    # Scratch columns >= pad + xlen are intentionally left undefined: they feed
    # only the lane-padding output columns >= out_len, which the wrapper
    # slices away (reading our own uninitialized scratch is safe).

    span = (out_cols - 1) * stride + 1          # stride-1 sliding-max width

    if window <= 4:
        # Linear chain of shifted ref loads; only the running max stays live.
        acc = scr_ref[:, pl.ds(0, span)]
        for k in range(1, window):
            acc = jnp.maximum(acc, scr_ref[:, pl.ds(k, span)])
    else:
        # log2(window) doubling: f_{2w}[i] = max(f_w[i], f_w[i+w]); a final
        # overlapping combine handles non-power-of-two windows.
        width = span + window - 1
        cur = scr_ref[:, pl.ds(0, width)]       # f_1
        w = 1
        avail = width
        while 2 * w <= window:
            avail -= w
            cur = jnp.maximum(cur[:, :avail], cur[:, w:w + avail])
            w *= 2
        if w < window:
            shift = window - w
            avail -= shift
            cur = jnp.maximum(cur[:, :avail], cur[:, shift:shift + avail])
        acc = cur                               # width == span

    if stride == 1:
        o_ref[...] = acc
    else:
        # One strided subsample at the end (not `window` strided loads).
        o_ref[...] = acc[:, ::stride]


def my_max_pool1d(x, window, stride=1, min_length=-1, padding='zero'):
    """Forward pass of MyMaxPool1d.  x: (N, C, L) array."""
    N, C, L = x.shape
    if L < min_length:
        return x                                 # PyTorch branch: too short -> identity
    if window <= 0 or stride <= 0:
        raise ValueError(f"window ({window}) and stride ({stride}) must be positive")

    mod = L % window
    pad = (window - mod) if (mod != 0 and padding != 'zero') else 0
    Lp = L + pad                                  # length after (fused) cyclic padding
    if Lp < window:
        raise ValueError(f"window={window} larger than (padded) length {Lp}")
    out_len = (Lp - window) // stride + 1

    rows = N * C
    x2 = x.reshape(rows, L)
    itemsize = jnp.dtype(x.dtype).itemsize

    # Lane-dense output: kernel writes a multiple-of-128-wide block; wrapper slices.
    out_cols = -(-out_len // _LANES) * _LANES
    span = (out_cols - 1) * stride + 1
    s_width = max(span + window - 1, Lp)          # VMEM scratch row width

    # ---- row-tile sizing ---------------------------------------------------
    # dtype-native sublane packing: f32 -> 8, bf16/fp16 -> 16, int8/fp8 -> 32.
    sub = {1: 32, 2: 16}.get(itemsize, 8)
    rows_r = -(-rows // sub) * sub

    # Per-row VMEM bytes: double-buffered (wrap + x + out) blocks, the scratch
    # buffer, plus an allowance for Mosaic-materialized temporaries (strided
    # subsample / doubling intermediates).
    per_row = 2 * itemsize * (pad + L + out_cols) + itemsize * s_width
    per_row += itemsize * span
    if window > 4:
        per_row += itemsize * s_width

    budget = 24 * 1024 * 1024                     # total per-kernel VMEM target
    floor_rows = -(-(2 * 1024 * 1024) // per_row) # keep blocks >= ~2 MiB
    tr = budget // per_row
    tr = min(tr, 4096)                            # raised row cap (was 512)
    # Megacore: prefer >= 8 grid steps when the row count allows (both v7x TCs
    # get work under "parallel"), but never shrink a block below ~2 MiB.
    tr = min(tr, max(rows_r // 8, floor_rows))
    tr = min(tr, rows_r)
    tr = max(sub, (tr // sub) * sub)
    # TODO(synk): chunk the L axis with a (window-1) halo (overlapping /
    # element-offset index_map) for extremely long rows where even a `sub`-row
    # block exceeds the VMEM budget (first bites on v7x's 64 MiB VMEM).

    footprint = tr * per_row
    vmem_limit = int(max(footprint + 8 * 1024 * 1024, 16 * 1024 * 1024))

    grid = (pl.cdiv(rows, tr),)
    kernel = functools.partial(
        _maxpool_rows_kernel, window=window, stride=stride, pad=pad,
        xlen=L, out_cols=out_cols)

    args = []
    in_specs = []
    if pad:
        # Fused cyclic padding: only the trailing `pad` columns travel twice.
        args.append(x2[:, L - pad:])
        in_specs.append(pl.BlockSpec((tr, pad), lambda i: (i, 0)))
    args.append(x2)
    in_specs.append(pl.BlockSpec((tr, L), lambda i: (i, 0)))

    cost = pl.CostEstimate(
        flops=rows * out_len * max(window - 1, 1),
        transcendentals=0,
        bytes_accessed=itemsize * rows * (L + pad + out_len))

    out2 = pl.pallas_call(
        kernel,
        out_shape=jax.ShapeDtypeStruct((rows, out_cols), x.dtype),
        grid=grid,
        in_specs=in_specs,
        out_specs=pl.BlockSpec((tr, out_cols), lambda i: (i, 0)),
        scratch_shapes=[pltpu.VMEM((tr, s_width), x.dtype)],
        compiler_params=pltpu.CompilerParams(
            dimension_semantics=("parallel",),
            vmem_limit_bytes=vmem_limit),
        cost_estimate=cost,
    )(*args)

    if out_cols != out_len:
        out2 = out2[:, :out_len]                  # drop lane padding (fuses under jit)
    return out2.reshape(N, C, out_len)


def _reference(x, window, stride=1, min_length=-1, padding='zero'):
    # Pure-JAX reference reproducing the PyTorch semantics.
    N, C, L = x.shape
    if L < min_length:
        return x
    mod = L % window
    if mod != 0 and padding != 'zero':
        x = jnp.concatenate([x[:, :, -(window - mod):], x], axis=2)
    Lp = x.shape[-1]
    out_len = (Lp - window) // stride + 1
    cols = [x[:, :, j * stride:j * stride + window] for j in range(out_len)]
    stacked = jnp.stack(cols, axis=2)             # (N, C, out_len, window)
    return jnp.max(stacked, axis=-1)


if __name__ == "__main__":
    # MyMaxPool1d has no learnable parameters; only config
    # (window / stride / min_length / padding).
    key = jax.random.PRNGKey(0)
    N, C, L = 2, 4, 16
    x = jax.random.normal(key, (N, C, L), dtype=jnp.float32)

    def check(out, ref):
        out = jax.block_until_ready(out)
        assert out.shape == ref.shape, (out.shape, ref.shape)
        np.testing.assert_allclose(np.asarray(out), np.asarray(ref), rtol=0, atol=0)

    # 1) cyclic padding, stride 1 -- permutation-invariant path, fused wrap input.
    check(my_max_pool1d(x, 3, 1, -1, 'cyclic'), _reference(x, 3, 1, -1, 'cyclic'))

    # 2) 'zero' (i.e. no) padding, stride 2 -- strided-subsample branch.
    check(my_max_pool1d(x, 3, 2, -1, 'zero'), _reference(x, 3, 2, -1, 'zero'))

    # 3) window > 4 -- log2-doubling branch, combined with cyclic padding.
    check(my_max_pool1d(x, 6, 1, -1, 'cyclic'), _reference(x, 6, 1, -1, 'cyclic'))

    # 4) bf16 -- exercises dtype-aware (16-row) sublane packing.
    xb = jax.random.normal(jax.random.PRNGKey(1), (2, 8, 16), dtype=jnp.bfloat16)
    check(my_max_pool1d(xb, 3, 1, -1, 'cyclic'), _reference(xb, 3, 1, -1, 'cyclic'))

    # 5) sequence shorter than min_length -> identity (no kernel launched).
    out5 = jax.block_until_ready(my_max_pool1d(x, 3, 1, 100, 'cyclic'))
    np.testing.assert_allclose(np.asarray(out5), np.asarray(x), rtol=0, atol=0)

    print("KERNEL_OK")
</pallas_src>

<mosaic_0001>
module attributes {stable_mosaic.version = 11 : i64} {
  func.func @_maxpool_rows_kernel(%arg0: i32, %arg1: memref<8x2xf32, #tpu.memory_space<vmem>>, %arg2: memref<8x16xf32, #tpu.memory_space<vmem>>, %arg3: memref<8x128xf32, #tpu.memory_space<vmem>>, %arg4: memref<8x130xf32, #tpu.memory_space<vmem>>) attributes {dimension_semantics = [#tpu.dimension_semantics<parallel>], iteration_bounds = array<i64: 1>, scalar_prefetch = 0 : i64, scratch_operands = 1 : i64, tpu.core_type = #tpu.core_type<tc>, window_params = [{transform_indices = @transform_0, window_bounds = array<i64: 8, 2>}, {transform_indices = @transform_1, window_bounds = array<i64: 8, 16>}, {transform_indices = @transform_2, window_bounds = array<i64: 8, 128>}]} {
    %c0 = arith.constant 0 : index
    %c0_0 = arith.constant 0 : index
    %0 = vector.load %arg1[%c0, %c0_0] : memref<8x2xf32, #tpu.memory_space<vmem>>, vector<8x2xf32>
    %c0_1 = arith.constant 0 : index
    %c0_2 = arith.constant 0 : index
    %1 = vector.load %arg4[%c0_1, %c0_2] : memref<8x130xf32, #tpu.memory_space<vmem>>, vector<8x2xf32>
    tpu.vector_store %arg4[%c0_1, %c0_2], %0 {strides = array<i32>} : memref<8x130xf32, #tpu.memory_space<vmem>>, vector<8x2xf32>,
    %c0_3 = arith.constant 0 : index
    %c0_4 = arith.constant 0 : index
    %2 = vector.load %arg2[%c0_3, %c0_4] : memref<8x16xf32, #tpu.memory_space<vmem>>, vector<8x16xf32>
    %c0_5 = arith.constant 0 : index
    %c2 = arith.constant 2 : index
    %3 = vector.load %arg4[%c0_5, %c2] : memref<8x130xf32, #tpu.memory_space<vmem>>, vector<8x16xf32>
    tpu.vector_store %arg4[%c0_5, %c2], %2 {strides = array<i32>} : memref<8x130xf32, #tpu.memory_space<vmem>>, vector<8x16xf32>,
    %c0_6 = arith.constant 0 : index
    %c0_7 = arith.constant 0 : index
    %4 = vector.load %arg4[%c0_6, %c0_7] : memref<8x130xf32, #tpu.memory_space<vmem>>, vector<8x128xf32>
    %c0_8 = arith.constant 0 : index
    %c1 = arith.constant 1 : index
    %5 = vector.load %arg4[%c0_8, %c1] : memref<8x130xf32, #tpu.memory_space<vmem>>, vector<8x128xf32>
    %6 = arith.maximumf %4, %5 : vector<8x128xf32>
    %c0_9 = arith.constant 0 : index
    %c2_10 = arith.constant 2 : index
    %7 = vector.load %arg4[%c0_9, %c2_10] : memref<8x130xf32, #tpu.memory_space<vmem>>, vector<8x128xf32>
    %8 = arith.maximumf %6, %7 : vector<8x128xf32>
    %c0_11 = arith.constant 0 : index
    %c0_12 = arith.constant 0 : index
    %9 = vector.load %arg3[%c0_11, %c0_12] : memref<8x128xf32, #tpu.memory_space<vmem>>, vector<8x128xf32>
    tpu.vector_store %arg3[%c0_11, %c0_12], %8 {strides = array<i32>} : memref<8x128xf32, #tpu.memory_space<vmem>>, vector<8x128xf32>,
    return
  }
  func.func @transform_0(%arg0: i32) -> (i32, i32) {
    %c0_i32 = arith.constant 0 : i32
    %c0_i32_0 = arith.constant 0 : i32
    return %arg0, %c0_i32 : i32, i32
  }
  func.func @transform_1(%arg0: i32) -> (i32, i32) {
    %c0_i32 = arith.constant 0 : i32
    %c0_i32_0 = arith.constant 0 : i32
    return %arg0, %c0_i32 : i32, i32
  }
  func.func @transform_2(%arg0: i32) -> (i32, i32) {
    %c0_i32 = arith.constant 0 : i32
    %c0_i32_0 = arith.constant 0 : i32
    return %arg0, %c0_i32 : i32, i32
  }
}

</mosaic_0001>

<bundles_post_ra>
// kernel: tpu_custom_call.1
= control target key start
LH: loop header
LB: loop body
LE: loop exit
PB: predicated region body
PF: predicated region fallthrough
CT: control target
= control target key end

     0   :  { %vm13_vm0 = vcmask 15360   ;;  %v23_v2 = vld [vmem:[#allocation2 + $0x8] sm:$0xff]  ;;  %s83_s13 = smov 2   ;;  %s111_s0 = inlined_call_operand.vmem [shape: f32[8,2], index: 0, kind: input, shape index: {}]   ;;  %s112_s1 = inlined_call_operand.vmem [shape: f32[8,16], index: 1, kind: input, shape index: {}]   ;;  %s113_s2 = inlined_call_operand.hbm [shape: f32[8,128], index: 2, kind: output, shape index: {}]  }
   0x1   :  { %v15_v0 = vld [vmem:[%s112_s1] sm:$0xff] }
   0x2   :  { %v12_v1 = vld [vmem:[%s111_s0] sm:$0xff]  ;;  %17 = vrot.lane.b32.xlu0 %v15_v0, %s83_s13 }
   0x3   :  { %14 = vst.msk [vmem:[#allocation2] sm:$0xff] %vm13_vm0, %v12_v1 }
   0x4   :  { %7 = vsyncpa [#allocation4], 0  ;;  %s84_s14 = smov 127   ;;  %vm20_vm1 = vcmask 146448   ;;  %s85_s15 = smov 126   ;;  %vm30_vm2 = vcmask 1039360  }
   0x5   :  { %28 = vrot.lane.b32.xlu1 %v23_v2, %s84_s14  ;;  %vm38_vm3 = vcmask 1031168   ;;  %s86_s0 = smov [#allocation3]  }
   0x6   :  { %s49_s1 = sshll.u32 %s86_s0, 4  ;;  %s50_s1 = int_to_ptr.vmem [resolvable:$true] %s49_s1 }
   0x7   :  { %s61_s16 = scalar_lea.vmem %s50_s1, 128  ;;  %p66_p1 = scmp.lt.s32.totalorder %s50_s1, %s50_s1 }
   0x8   :  { %p62_p0 = scmp.ne.s32.totalorder %s50_s1, %s61_s16  ;;  %p67_p2 = scmp.lt.s32.totalorder %s61_s16, %s61_s16 }
   0xa   :  { %p68_p3 = por %p67_p2, %p66_p1 }
   0xc   :  { %p69_p4 = pnand %p68_p3, %p62_p0 }
  0x74   :  { %v18_v3 = vpop.permute.xlu0 %17 }
  0x75   :  { %21 = vst.msk [vmem:[#allocation2] sm:$0xff] %vm20_vm1, %v18_v3 }
  0x77   :  { %v29_v5 = vpop.permute.xlu1 %28 }
  0x7c   :  { %v22_v4 = vld [vmem:[#allocation2] sm:$0xff] }
  0x7d   :  { %34 = vrot.lane.b32.xlu1 %v22_v4, %s85_s15  ;;  %26 = vrot.lane.b32.xlu0 %v22_v4, %s84_s14 }
  0x81   :  { %36 = vrot.lane.b32.xlu0 %v23_v2, %s85_s15 }
  0xef   :  { %v27_v6 = vpop.permute.xlu0 %26  ;;  %v35_v8 = vpop.permute.xlu1 %34 }
  0xf0   :  { %v31_v7 = vsel %vm30_vm2, %v27_v6, %v29_v5 }
  0xf1   :  { %v33_v9 = vmax.f32 %v22_v4, %v31_v7 }
  0xf3   :  { %v37_v10 = vpop.permute.xlu0 %36 }
  0xf4   :  { %v39_v11 = vsel %vm38_vm3, %v35_v8, %v37_v10 }
  0xf5   :  { %v41_v12 = vmax.f32 %v33_v9, %v39_v11 }
  0xf7   :  { %42 = vst [vmem:[#allocation3] sm:$0xff] %v41_v12 }
  0xf8   :  { %72 = shalt.err (!%p69_p4)
}
  0xf9   :  { %52 = dma.vmem_to_hbm [thread:$0]  %s50_s1, 128, %s113_s2, [#allocation4]  }
  0xfa   :  { %81 = dma.done.wait [#allocation4], 128  }
  0xfb   :  { %82 = vsyncadd [#allocation4], 4294967168 }
  0xfc   :  { %56 = vsyncpa [#allocation4], 1 }

</bundles_post_ra>
